<compile_context>
chip_gen: v7x
topology: tpu7x:2x2x1
jax: 0.10.0
libtpu: 0.0.40
codegen_flags: <defaults>
</compile_context>

<pallas_src>
import functools

import jax
import jax.numpy as jnp
from jax.experimental import pallas as pl
from jax.experimental.pallas import tpu as pltpu

VMEM = pltpu.MemorySpace.VMEM
SMEM = pltpu.MemorySpace.SMEM

LANES = 128          # class axis padded to one full lane width
NEG_INF = -1e30      # finite "minus infinity" for masked softmax columns


# ----------------------------- Pallas kernel ------------------------------

def _class_mask(cp, n_cls):
    # (1, cp) boolean mask of the valid (un-padded) class lanes.
    return jax.lax.broadcasted_iota(jnp.int32, (1, cp), 1) < n_cls


def _mlp_logits(x_bf16, wm_ref, bm_ref, wc_ref, bc_ref):
    # relu(x @ Wm + bm) @ Wc + bc ; bf16 MXU operands, f32 accumulation
    # (matches the reference's AMP autocast).
    h = jnp.dot(x_bf16, wm_ref[...], preferred_element_type=jnp.float32)
    h = jnp.maximum(h + bm_ref[...], 0.0)
    return jnp.dot(h.astype(jnp.bfloat16), wc_ref[...],
                   preferred_element_type=jnp.float32) + bc_ref[...]


def _remixmatch_kernel(lam_ref, x_all_ref, x_perm_ref, one_hot_ref, perm_ref,
                       p_target_ref, wm_ref, bm_ref, wc_ref, bc_ref,
                       logits_x_ref, p_model_ref, u1ce_ref, cex_ref, ceu_ref,
                       y_scr, *, inv_T, n_cls, b):
    cp = wc_ref.shape[-1]
    mask = _class_mask(cp, n_cls)

    # ---- pass 1: un-mixed logits for all 4B rows [x; u_s1; u_s2; u_w].
    #      Weights are VMEM-resident for both passes (loaded from HBM once).
    #      The 2B rows we don't use (x, u_s2) are essentially free in the
    #      weight-bandwidth-bound regime and avoid a slab repack. ----
    logits_un = _mlp_logits(x_all_ref[...], wm_ref, bm_ref, wc_ref, bc_ref)
    logits_un = jnp.where(mask, logits_un, NEG_INF)   # pads never win softmax
    logits_s1 = logits_un[b:2 * b, :]                 # strong-aug u_s1 rows
    logits_w = logits_un[3 * b:4 * b, :]              # weak-aug u_w rows

    # ---- pseudo labels: softmax + distribution alignment + sharpening.
    #      Exact divisions here (tiny [B,128] slabs; review correctness note).
    m = jnp.max(logits_w, axis=-1, keepdims=True)
    e = jnp.exp(logits_w - m)
    prob = e / jnp.sum(e, axis=-1, keepdims=True)

    # TODO(synk): the reference keeps a 0.999/0.001 EMA of p_model across
    # training steps (module state); this single-forward kernel implements the
    # first-step rule (p_model is None -> within-batch mean) and returns
    # p_model so the caller can carry the EMA.
    p_model = jnp.mean(prob, axis=0, keepdims=True)
    p_model_ref[...] = p_model
    p_model_safe = jnp.where(mask, jnp.maximum(p_model, 1e-12), 1.0)
    aligned = prob * p_target_ref[...] / p_model_safe
    aligned = aligned / jnp.sum(aligned, axis=-1, keepdims=True)
    aligned = jnp.where(mask, aligned, 1.0)           # safe base for the power
    if inv_T == 2.0:                                  # ReMixMatch default T=0.5
        sharp = aligned * aligned
    else:
        sharp = jnp.exp(inv_T * jnp.log(aligned))
    sharp = jnp.where(mask, sharp, 0.0)
    sharp = sharp / jnp.sum(sharp, axis=-1, keepdims=True)

    # ---- u1 soft CE partials: -sum(sharpen * log_softmax(u_s1 logits)) ----
    m1 = jnp.max(logits_s1, axis=-1, keepdims=True)
    sh1 = logits_s1 - m1
    log_pred1 = sh1 - jnp.log(jnp.sum(jnp.exp(sh1), axis=-1, keepdims=True))
    u1ce_ref[...] = jnp.sum(-sharp * log_pred1, axis=0, keepdims=True)

    # ---- label slab [one_hot ; sharp ; sharp ; sharp] built in VMEM scratch
    #      (never round-trips HBM), then permuted in-kernel via a one-hot
    #      permutation matmul: y_perm[i] = y_all[index[i]]. ----
    y_scr[pl.ds(0, b), :] = one_hot_ref[...]
    y_scr[pl.ds(b, b), :] = sharp
    y_scr[pl.ds(2 * b, b), :] = sharp
    y_scr[pl.ds(3 * b, b), :] = sharp
    y_all = y_scr[...]
    y_perm = jnp.dot(perm_ref[...], y_all, preferred_element_type=jnp.float32)

    # ---- mixup blend (bf16, inputs already bf16) + mixed forward ----
    lam = lam_ref[0, 0]
    lam_b = lam.astype(jnp.bfloat16)
    oml_b = (1.0 - lam).astype(jnp.bfloat16)
    mixed_x = lam_b * x_all_ref[...] + oml_b * x_perm_ref[...]
    mixed_y = lam * y_all + (1.0 - lam) * y_perm

    # NOTE: the reference's interleave() only swaps rows between equal-size
    # chunks before/after the per-chunk forward (a BatchNorm-statistics trick);
    # with a per-row, BN-free surrogate model the double interleave is the
    # identity on logits, so one batched forward over all 4B rows is exact.
    logits_mix = _mlp_logits(mixed_x, wm_ref, bm_ref, wc_ref, bc_ref)
    logits_mix = jnp.where(mask, logits_mix, NEG_INF)
    logits_x_ref[...] = logits_mix[0:b, :]            # only labeled rows stored

    # ---- soft CE, lane-dense (1,128) per-class partials, labeled/unlabeled ----
    mm = jnp.max(logits_mix, axis=-1, keepdims=True)
    sh = logits_mix - mm
    log_pred = sh - jnp.log(jnp.sum(jnp.exp(sh), axis=-1, keepdims=True))
    contrib = -mixed_y * log_pred                     # pad lanes contribute 0
    row = jax.lax.broadcasted_iota(jnp.int32, contrib.shape, 0)
    is_lab = row < b
    cex_ref[...] = jnp.sum(jnp.where(is_lab, contrib, 0.0), axis=0, keepdims=True)
    ceu_ref[...] = jnp.sum(jnp.where(is_lab, 0.0, contrib), axis=0, keepdims=True)


# ----------------------------- kernel wrapper ------------------------------

def remixmatch_fused_call(x_all, x_perm, one_hot_x, perm_mat, lam, params_pad,
                          p_target_pad, T, n_cls, b):
    wm, bm, wc, bc = params_pad
    cp = wc.shape[1]
    n, d = x_all.shape
    hidden = wm.shape[1]
    lam_arr = jnp.asarray(lam, jnp.float32).reshape(1, 1)

    # advisory cost estimate so XLA can overlap the surrounding permutation /
    # one-hot ops with this call
    mlp_flops = 2 * (2 * n) * (d * hidden + hidden * cp)
    flops = mlp_flops + 2 * n * n * cp
    transcendentals = 8 * b * cp + 2 * n * cp
    bytes_accessed = (2 * n * d * 2                       # x_all + x_perm (bf16)
                      + (d * hidden + hidden * cp) * 2    # bf16 weights
                      + (hidden + 2 * cp) * 4             # biases + p_target
                      + (b * cp + n * n) * 4              # one_hot + perm_mat
                      + (b * cp + 4 * cp) * 4)            # outputs
    cost = pl.CostEstimate(flops=flops, transcendentals=transcendentals,
                           bytes_accessed=bytes_accessed)

    kernel = functools.partial(_remixmatch_kernel, inv_T=1.0 / T,
                               n_cls=n_cls, b=b)
    return pl.pallas_call(
        kernel,
        out_shape=(
            jax.ShapeDtypeStruct((b, cp), jnp.float32),   # labeled-row logits
            jax.ShapeDtypeStruct((1, cp), jnp.float32),   # p_model (batch mean)
            jax.ShapeDtypeStruct((1, cp), jnp.float32),   # u1 CE per-class partials
            jax.ShapeDtypeStruct((1, cp), jnp.float32),   # Lx per-class partials
            jax.ShapeDtypeStruct((1, cp), jnp.float32),   # Lu per-class partials
        ),
        in_specs=[pl.BlockSpec(memory_space=SMEM)]        # lam scalar
        + [pl.BlockSpec(memory_space=VMEM)] * 9,
        out_specs=(pl.BlockSpec(memory_space=VMEM),) * 5,
        scratch_shapes=[pltpu.VMEM((n, cp), jnp.float32)],  # label slab y_all
        # TODO(synk): raise toward ~64 MiB on v6e for full wm residency at
        # D~3072, and switch to a K-tiled grid on v7x (64 MiB physical VMEM).
        compiler_params=pltpu.CompilerParams(vmem_limit_bytes=32 * 1024 * 1024),
        cost_estimate=cost,
    )(lam_arr, x_all, x_perm, one_hot_x, perm_mat, p_target_pad, wm, bm, wc, bc)


# ------------------------------ glue helpers ------------------------------

def linear_rampup(current, tot_epochs):
    return float(min(max(current / tot_epochs, 0.0), 1.0))


# ------------------------------ forward pass ------------------------------

def remixmatch_forward(labeled_data, unlabeled_data, params, *, p_target, T,
                       mixup_beta, n_cls, tot_epochs, eval_step, epoch_info,
                       rng_key):
    inputs_x, targets_x = labeled_data
    inputs_u_w, inputs_u_s1, inputs_u_s2 = unlabeled_data
    b = inputs_x.shape[0]

    # flatten (free reshape) + bf16 cast per input, ONE concat in bf16.
    # Row order matches the reference's mixed_inputs: [x ; u_s1 ; u_s2 ; u_w].
    def flat_bf16(x):
        return x.reshape(x.shape[0], -1).astype(jnp.bfloat16)

    x_all = jnp.concatenate(
        [flat_bf16(inputs_x), flat_bf16(inputs_u_s1),
         flat_bf16(inputs_u_s2), flat_bf16(inputs_u_w)], axis=0)
    n = 4 * b

    # ---- lane-pad the class axis of classifier params / priors to 128 ----
    wm, bm, wc, bc = params
    hidden = wm.shape[1]
    cp = LANES
    wc_pad = jnp.zeros((hidden, cp), jnp.float32).at[:, :n_cls].set(wc)
    bc_pad = jnp.zeros((1, cp), jnp.float32).at[:, :n_cls].set(bc.reshape(1, -1))
    p_target_pad = jnp.zeros((1, cp), jnp.float32).at[0, :n_cls].set(p_target)
    params_pad = (wm.astype(jnp.bfloat16), bm.astype(jnp.float32).reshape(1, -1),
                  wc_pad.astype(jnp.bfloat16), bc_pad)

    one_hot_x = jax.nn.one_hot(targets_x, cp, dtype=jnp.float32)   # pads are 0

    # mixup_one_target with is_bias=True (lam = max(lam, 1-lam)); randomness
    # comes from jax.random instead of np.random / torch.randperm.
    key_lam, key_perm = jax.random.split(rng_key)
    lam = jax.random.beta(key_lam, mixup_beta, mixup_beta)
    lam = jnp.maximum(lam, 1.0 - lam)
    index = jax.random.permutation(key_perm, n)
    # TODO(synk): the big [4B,D] activation gather stays in XLA (an in-kernel
    # gather would force 1-row blocks and hurt MXU occupancy); only the tiny
    # [4B,4B] permutation matrix for the label gather is passed in.
    x_perm = x_all[index]
    perm_mat = jax.nn.one_hot(index, n, dtype=jnp.float32)

    logits_x_pad, _p_model, u1ce, cex, ceu = remixmatch_fused_call(
        x_all, x_perm, one_hot_x, perm_mat, lam, params_pad, p_target_pad,
        T, n_cls, b)

    logits_x = logits_x_pad[:, :n_cls]
    Lx = jnp.sum(cex) / b
    Lu = jnp.sum(ceu) / (3 * b)
    u1_loss = jnp.sum(u1ce) / b

    ramp = linear_rampup(epoch_info[0] + epoch_info[1] / eval_step, tot_epochs)
    w_match = 1.5 * ramp
    w_kl = 0.5 * ramp
    Lu = Lu * w_match
    loss = Lx + Lu + w_kl * u1_loss
    return loss, Lx, Lu, logits_x, targets_x


# ---------------------------------- main -----------------------------------

if __name__ == "__main__":
    key = jax.random.PRNGKey(0)
    ks = jax.random.split(key, 10)

    B, C, Himg, Wimg = 8, 4, 8, 8        # labeled batch == unlabeled batch
    n_cls = 8
    hidden = 128
    D = C * Himg * Wimg                  # 256

    inputs_x = jax.random.normal(ks[0], (B, C, Himg, Wimg), jnp.float32)
    targets_x = jax.random.randint(ks[1], (B,), 0, n_cls)
    inputs_u_w = jax.random.normal(ks[2], (B, C, Himg, Wimg), jnp.float32)
    inputs_u_s1 = jax.random.normal(ks[3], (B, C, Himg, Wimg), jnp.float32)
    inputs_u_s2 = jax.random.normal(ks[4], (B, C, Himg, Wimg), jnp.float32)

    # deterministic synthetic "model" + "classifier" parameters
    wm = jax.random.normal(ks[5], (D, hidden), jnp.float32) / jnp.sqrt(float(D))
    bm = jnp.zeros((1, hidden), jnp.float32)
    wc = jax.random.normal(ks[6], (hidden, n_cls), jnp.float32) / jnp.sqrt(float(hidden))
    bc = jnp.zeros((1, n_cls), jnp.float32)
    params = (wm, bm, wc, bc)

    p_target = jnp.full((n_cls,), 1.0 / n_cls, jnp.float32)

    out = remixmatch_forward(
        (inputs_x, targets_x),
        (inputs_u_w, inputs_u_s1, inputs_u_s2),
        params,
        p_target=p_target,
        T=0.5,
        mixup_beta=0.75,
        n_cls=n_cls,
        tot_epochs=10,
        eval_step=100,
        epoch_info=(3, 50),
        rng_key=ks[7],
    )
    loss, Lx, Lu, logits_x, targets_out = jax.block_until_ready(out)
    assert logits_x.shape == (B, n_cls)
    assert loss.shape == ()
    assert bool(jnp.isfinite(loss))
    print("KERNEL_OK")
</pallas_src>

<mosaic_0001>
module attributes {stable_mosaic.version = 11 : i64} {
  func.func @_remixmatch_kernel(%arg0: memref<1x1xf32, #tpu.memory_space<smem>>, %arg1: memref<32x256xbf16, #tpu.memory_space<vmem>>, %arg2: memref<32x256xbf16, #tpu.memory_space<vmem>>, %arg3: memref<8x128xf32, #tpu.memory_space<vmem>>, %arg4: memref<32x32xf32, #tpu.memory_space<vmem>>, %arg5: memref<1x128xf32, #tpu.memory_space<vmem>>, %arg6: memref<256x128xbf16, #tpu.memory_space<vmem>>, %arg7: memref<1x128xf32, #tpu.memory_space<vmem>>, %arg8: memref<128x128xbf16, #tpu.memory_space<vmem>>, %arg9: memref<1x128xf32, #tpu.memory_space<vmem>>, %arg10: memref<8x128xf32, #tpu.memory_space<vmem>>, %arg11: memref<1x128xf32, #tpu.memory_space<vmem>>, %arg12: memref<1x128xf32, #tpu.memory_space<vmem>>, %arg13: memref<1x128xf32, #tpu.memory_space<vmem>>, %arg14: memref<1x128xf32, #tpu.memory_space<vmem>>, %arg15: memref<32x128xf32, #tpu.memory_space<vmem>>) attributes {dimension_semantics = [], scalar_prefetch = 0 : i64, scratch_operands = 1 : i64, tpu.core_type = #tpu.core_type<tc>} {
    %0 = tpu.iota {dimensions = array<i32: 1>} : vector<1x128xi32>
    %c8_i32 = arith.constant 8 : i32
    %1 = vector.broadcast %c8_i32 : i32 to vector<1x128xi32>
    %2 = arith.cmpi slt, %0, %1 : vector<1x128xi32>
    %c0 = arith.constant 0 : index
    %c0_0 = arith.constant 0 : index
    %3 = vector.load %arg1[%c0, %c0_0] : memref<32x256xbf16, #tpu.memory_space<vmem>>, vector<32x256xbf16>
    %c0_1 = arith.constant 0 : index
    %c0_2 = arith.constant 0 : index
    %4 = vector.load %arg6[%c0_1, %c0_2] : memref<256x128xbf16, #tpu.memory_space<vmem>>, vector<256x128xbf16>
    %cst = arith.constant dense<0.000000e+00> : vector<32x128xf32>
    %5 = tpu.matmul %3, %4, %cst {dimension_numbers = #tpu.dot_dimension_numbers<[1], [0], [0], [1], [0, 0, 1, 1], [], []>} : vector<32x256xbf16>, vector<256x128xbf16>, vector<32x128xf32> -> vector<32x128xf32>
    %c0_3 = arith.constant 0 : index
    %c0_4 = arith.constant 0 : index
    %6 = vector.load %arg7[%c0_3, %c0_4] : memref<1x128xf32, #tpu.memory_space<vmem>>, vector<1x128xf32>
    %7 = vector.broadcast %6 : vector<1x128xf32> to vector<32x128xf32>
    %8 = arith.addf %5, %7 : vector<32x128xf32>
    %cst_5 = arith.constant 0.000000e+00 : f32
    %9 = vector.broadcast %cst_5 : f32 to vector<32x128xf32>
    %10 = arith.maximumf %8, %9 : vector<32x128xf32>
    %11 = arith.truncf %10 : vector<32x128xf32> to vector<32x128xbf16>
    %c0_6 = arith.constant 0 : index
    %c0_7 = arith.constant 0 : index
    %12 = vector.load %arg8[%c0_6, %c0_7] : memref<128x128xbf16, #tpu.memory_space<vmem>>, vector<128x128xbf16>
    %cst_8 = arith.constant dense<0.000000e+00> : vector<32x128xf32>
    %13 = tpu.matmul %11, %12, %cst_8 {dimension_numbers = #tpu.dot_dimension_numbers<[1], [0], [0], [1], [0, 0, 1, 1], [], []>} : vector<32x128xbf16>, vector<128x128xbf16>, vector<32x128xf32> -> vector<32x128xf32>
    %c0_9 = arith.constant 0 : index
    %c0_10 = arith.constant 0 : index
    %14 = vector.load %arg9[%c0_9, %c0_10] : memref<1x128xf32, #tpu.memory_space<vmem>>, vector<1x128xf32>
    %15 = vector.broadcast %14 : vector<1x128xf32> to vector<32x128xf32>
    %16 = arith.addf %13, %15 : vector<32x128xf32>
    %cst_11 = arith.constant -1.000000e+30 : f32
    %17 = vector.shape_cast %2 : vector<1x128xi1> to vector<1x128xi1>
    %18 = vector.broadcast %17 : vector<1x128xi1> to vector<32x128xi1>
    %19 = vector.broadcast %cst_11 : f32 to vector<32x128xf32>
    %20 = arith.select %18, %16, %19 : vector<32x128xi1>, vector<32x128xf32>
    %21 = vector.extract_strided_slice %20 {offsets = [8, 0], sizes = [8, 128], strides = [1, 1]} : vector<32x128xf32> to vector<8x128xf32>
    %22 = vector.extract_strided_slice %20 {offsets = [24, 0], sizes = [8, 128], strides = [1, 1]} : vector<32x128xf32> to vector<8x128xf32>
    %cst_12 = arith.constant dense<0xFF800000> : vector<8xf32>
    %23 = vector.multi_reduction <maximumf>, %22, %cst_12 [1] : vector<8x128xf32> to vector<8xf32>
    %24 = vector.shape_cast %23 : vector<8xf32> to vector<8x1xf32>
    %25 = vector.broadcast %24 : vector<8x1xf32> to vector<8x128xf32>
    %26 = arith.subf %22, %25 : vector<8x128xf32>
    %27 = math.exp %26 : vector<8x128xf32>
    %cst_13 = arith.constant dense<0.000000e+00> : vector<8xf32>
    %28 = vector.multi_reduction <add>, %27, %cst_13 [1] : vector<8x128xf32> to vector<8xf32>
    %29 = vector.shape_cast %28 : vector<8xf32> to vector<8x1xf32>
    %30 = vector.broadcast %29 : vector<8x1xf32> to vector<8x128xf32>
    %31 = arith.divf %27, %30 : vector<8x128xf32>
    %cst_14 = arith.constant dense<0.000000e+00> : vector<128xf32>
    %32 = vector.multi_reduction <add>, %31, %cst_14 [0] : vector<8x128xf32> to vector<128xf32>
    %33 = vector.shape_cast %32 : vector<128xf32> to vector<1x128xf32>
    %cst_15 = arith.constant 8.000000e+00 : f32
    %34 = vector.broadcast %cst_15 : f32 to vector<1x128xf32>
    %35 = arith.divf %33, %34 : vector<1x128xf32>
    %c0_16 = arith.constant 0 : index
    %c0_17 = arith.constant 0 : index
    %36 = vector.load %arg11[%c0_16, %c0_17] : memref<1x128xf32, #tpu.memory_space<vmem>>, vector<1x128xf32>
    tpu.vector_store %arg11[%c0_16, %c0_17], %35 {strides = array<i32>} : memref<1x128xf32, #tpu.memory_space<vmem>>, vector<1x128xf32>,
    %cst_18 = arith.constant 9.99999996E-13 : f32
    %37 = vector.broadcast %cst_18 : f32 to vector<1x128xf32>
    %38 = arith.maximumf %35, %37 : vector<1x128xf32>
    %cst_19 = arith.constant 1.000000e+00 : f32
    %39 = vector.broadcast %cst_19 : f32 to vector<1x128xf32>
    %40 = arith.select %2, %38, %39 : vector<1x128xi1>, vector<1x128xf32>
    %c0_20 = arith.constant 0 : index
    %c0_21 = arith.constant 0 : index
    %41 = vector.load %arg5[%c0_20, %c0_21] : memref<1x128xf32, #tpu.memory_space<vmem>>, vector<1x128xf32>
    %42 = vector.broadcast %41 : vector<1x128xf32> to vector<8x128xf32>
    %43 = arith.mulf %31, %42 : vector<8x128xf32>
    %44 = vector.broadcast %40 : vector<1x128xf32> to vector<8x128xf32>
    %45 = arith.divf %43, %44 : vector<8x128xf32>
    %cst_22 = arith.constant dense<0.000000e+00> : vector<8xf32>
    %46 = vector.multi_reduction <add>, %45, %cst_22 [1] : vector<8x128xf32> to vector<8xf32>
    %47 = vector.shape_cast %46 : vector<8xf32> to vector<8x1xf32>
    %48 = vector.broadcast %47 : vector<8x1xf32> to vector<8x128xf32>
    %49 = arith.divf %45, %48 : vector<8x128xf32>
    %cst_23 = arith.constant 1.000000e+00 : f32
    %50 = vector.shape_cast %2 : vector<1x128xi1> to vector<1x128xi1>
    %51 = vector.broadcast %50 : vector<1x128xi1> to vector<8x128xi1>
    %52 = vector.broadcast %cst_23 : f32 to vector<8x128xf32>
    %53 = arith.select %51, %49, %52 : vector<8x128xi1>, vector<8x128xf32>
    %54 = arith.mulf %53, %53 : vector<8x128xf32>
    %cst_24 = arith.constant 0.000000e+00 : f32
    %55 = vector.shape_cast %2 : vector<1x128xi1> to vector<1x128xi1>
    %56 = vector.broadcast %55 : vector<1x128xi1> to vector<8x128xi1>
    %57 = vector.broadcast %cst_24 : f32 to vector<8x128xf32>
    %58 = arith.select %56, %54, %57 : vector<8x128xi1>, vector<8x128xf32>
    %cst_25 = arith.constant dense<0.000000e+00> : vector<8xf32>
    %59 = vector.multi_reduction <add>, %58, %cst_25 [1] : vector<8x128xf32> to vector<8xf32>
    %60 = vector.shape_cast %59 : vector<8xf32> to vector<8x1xf32>
    %61 = vector.broadcast %60 : vector<8x1xf32> to vector<8x128xf32>
    %62 = arith.divf %58, %61 : vector<8x128xf32>
    %cst_26 = arith.constant dense<0xFF800000> : vector<8xf32>
    %63 = vector.multi_reduction <maximumf>, %21, %cst_26 [1] : vector<8x128xf32> to vector<8xf32>
    %64 = vector.shape_cast %63 : vector<8xf32> to vector<8x1xf32>
    %65 = vector.broadcast %64 : vector<8x1xf32> to vector<8x128xf32>
    %66 = arith.subf %21, %65 : vector<8x128xf32>
    %67 = math.exp %66 : vector<8x128xf32>
    %cst_27 = arith.constant dense<0.000000e+00> : vector<8xf32>
    %68 = vector.multi_reduction <add>, %67, %cst_27 [1] : vector<8x128xf32> to vector<8xf32>
    %69 = vector.shape_cast %68 : vector<8xf32> to vector<8x1xf32>
    %70 = math.log %69 : vector<8x1xf32>
    %71 = vector.broadcast %70 : vector<8x1xf32> to vector<8x128xf32>
    %72 = arith.subf %66, %71 : vector<8x128xf32>
    %cst_28 = arith.constant 0.000000e+00 : f32
    %73 = vector.broadcast %cst_28 : f32 to vector<8x128xf32>
    %74 = arith.subf %73, %62 : vector<8x128xf32>
    %75 = arith.mulf %74, %72 : vector<8x128xf32>
    %cst_29 = arith.constant dense<0.000000e+00> : vector<128xf32>
    %76 = vector.multi_reduction <add>, %75, %cst_29 [0] : vector<8x128xf32> to vector<128xf32>
    %77 = vector.shape_cast %76 : vector<128xf32> to vector<1x128xf32>
    %c0_30 = arith.constant 0 : index
    %c0_31 = arith.constant 0 : index
    %78 = vector.load %arg12[%c0_30, %c0_31] : memref<1x128xf32, #tpu.memory_space<vmem>>, vector<1x128xf32>
    tpu.vector_store %arg12[%c0_30, %c0_31], %77 {strides = array<i32>} : memref<1x128xf32, #tpu.memory_space<vmem>>, vector<1x128xf32>,
    %c0_32 = arith.constant 0 : index
    %c0_33 = arith.constant 0 : index
    %79 = vector.load %arg3[%c0_32, %c0_33] : memref<8x128xf32, #tpu.memory_space<vmem>>, vector<8x128xf32>
    %c0_34 = arith.constant 0 : index
    %c0_35 = arith.constant 0 : index
    %80 = vector.load %arg15[%c0_34, %c0_35] : memref<32x128xf32, #tpu.memory_space<vmem>>, vector<8x128xf32>
    tpu.vector_store %arg15[%c0_34, %c0_35], %79 {strides = array<i32>} : memref<32x128xf32, #tpu.memory_space<vmem>>, vector<8x128xf32>,
    %c8 = arith.constant 8 : index
    %c0_36 = arith.constant 0 : index
    %81 = vector.load %arg15[%c8, %c0_36] : memref<32x128xf32, #tpu.memory_space<vmem>>, vector<8x128xf32>
    tpu.vector_store %arg15[%c8, %c0_36], %62 {strides = array<i32>} : memref<32x128xf32, #tpu.memory_space<vmem>>, vector<8x128xf32>,
    %c16 = arith.constant 16 : index
    %c0_37 = arith.constant 0 : index
    %82 = vector.load %arg15[%c16, %c0_37] : memref<32x128xf32, #tpu.memory_space<vmem>>, vector<8x128xf32>
    tpu.vector_store %arg15[%c16, %c0_37], %62 {strides = array<i32>} : memref<32x128xf32, #tpu.memory_space<vmem>>, vector<8x128xf32>,
    %c24 = arith.constant 24 : index
    %c0_38 = arith.constant 0 : index
    %83 = vector.load %arg15[%c24, %c0_38] : memref<32x128xf32, #tpu.memory_space<vmem>>, vector<8x128xf32>
    tpu.vector_store %arg15[%c24, %c0_38], %62 {strides = array<i32>} : memref<32x128xf32, #tpu.memory_space<vmem>>, vector<8x128xf32>,
    %c0_39 = arith.constant 0 : index
    %c0_40 = arith.constant 0 : index
    %84 = vector.load %arg15[%c0_39, %c0_40] : memref<32x128xf32, #tpu.memory_space<vmem>>, vector<32x128xf32>
    %c0_41 = arith.constant 0 : index
    %c0_42 = arith.constant 0 : index
    %85 = vector.load %arg4[%c0_41, %c0_42] : memref<32x32xf32, #tpu.memory_space<vmem>>, vector<32x32xf32>
    %cst_43 = arith.constant dense<0.000000e+00> : vector<32x128xf32>
    %86 = tpu.matmul %85, %84, %cst_43 {dimension_numbers = #tpu.dot_dimension_numbers<[1], [0], [0], [1], [0, 0, 1, 1], [], []>} : vector<32x32xf32>, vector<32x128xf32>, vector<32x128xf32> -> vector<32x128xf32>
    %c0_44 = arith.constant 0 : index
    %c0_45 = arith.constant 0 : index
    %87 = memref.load %arg0[%c0_44, %c0_45] : memref<1x1xf32, #tpu.memory_space<smem>>
    %88 = arith.truncf %87 : f32 to bf16
    %cst_46 = arith.constant 1.000000e+00 : f32
    %89 = arith.subf %cst_46, %87 : f32
    %90 = arith.truncf %89 : f32 to bf16
    %c0_47 = arith.constant 0 : index
    %c0_48 = arith.constant 0 : index
    %91 = vector.load %arg1[%c0_47, %c0_48] : memref<32x256xbf16, #tpu.memory_space<vmem>>, vector<32x256xbf16>
    %92 = vector.broadcast %88 : bf16 to vector<32x256xbf16>
    %93 = arith.mulf %92, %91 : vector<32x256xbf16>
    %c0_49 = arith.constant 0 : index
    %c0_50 = arith.constant 0 : index
    %94 = vector.load %arg2[%c0_49, %c0_50] : memref<32x256xbf16, #tpu.memory_space<vmem>>, vector<32x256xbf16>
    %95 = vector.broadcast %90 : bf16 to vector<32x256xbf16>
    %96 = arith.mulf %95, %94 : vector<32x256xbf16>
    %97 = arith.addf %93, %96 : vector<32x256xbf16>
    %98 = vector.broadcast %87 : f32 to vector<32x128xf32>
    %99 = arith.mulf %98, %84 : vector<32x128xf32>
    %cst_51 = arith.constant 1.000000e+00 : f32
    %100 = arith.subf %cst_51, %87 : f32
    %101 = vector.broadcast %100 : f32 to vector<32x128xf32>
    %102 = arith.mulf %101, %86 : vector<32x128xf32>
    %103 = arith.addf %99, %102 : vector<32x128xf32>
    %c0_52 = arith.constant 0 : index
    %c0_53 = arith.constant 0 : index
    %104 = vector.load %arg6[%c0_52, %c0_53] : memref<256x128xbf16, #tpu.memory_space<vmem>>, vector<256x128xbf16>
    %cst_54 = arith.constant dense<0.000000e+00> : vector<32x128xf32>
    %105 = tpu.matmul %97, %104, %cst_54 {dimension_numbers = #tpu.dot_dimension_numbers<[1], [0], [0], [1], [0, 0, 1, 1], [], []>} : vector<32x256xbf16>, vector<256x128xbf16>, vector<32x128xf32> -> vector<32x128xf32>
    %c0_55 = arith.constant 0 : index
    %c0_56 = arith.constant 0 : index
    %106 = vector.load %arg7[%c0_55, %c0_56] : memref<1x128xf32, #tpu.memory_space<vmem>>, vector<1x128xf32>
    %107 = vector.broadcast %106 : vector<1x128xf32> to vector<32x128xf32>
    %108 = arith.addf %105, %107 : vector<32x128xf32>
    %cst_57 = arith.constant 0.000000e+00 : f32
    %109 = vector.broadcast %cst_57 : f32 to vector<32x128xf32>
    %110 = arith.maximumf %108, %109 : vector<32x128xf32>
    %111 = arith.truncf %110 : vector<32x128xf32> to vector<32x128xbf16>
    %c0_58 = arith.constant 0 : index
    %c0_59 = arith.constant 0 : index
    %112 = vector.load %arg8[%c0_58, %c0_59] : memref<128x128xbf16, #tpu.memory_space<vmem>>, vector<128x128xbf16>
    %cst_60 = arith.constant dense<0.000000e+00> : vector<32x128xf32>
    %113 = tpu.matmul %111, %112, %cst_60 {dimension_numbers = #tpu.dot_dimension_numbers<[1], [0], [0], [1], [0, 0, 1, 1], [], []>} : vector<32x128xbf16>, vector<128x128xbf16>, vector<32x128xf32> -> vector<32x128xf32>
    %c0_61 = arith.constant 0 : index
    %c0_62 = arith.constant 0 : index
    %114 = vector.load %arg9[%c0_61, %c0_62] : memref<1x128xf32, #tpu.memory_space<vmem>>, vector<1x128xf32>
    %115 = vector.broadcast %114 : vector<1x128xf32> to vector<32x128xf32>
    %116 = arith.addf %113, %115 : vector<32x128xf32>
    %cst_63 = arith.constant -1.000000e+30 : f32
    %117 = vector.shape_cast %2 : vector<1x128xi1> to vector<1x128xi1>
    %118 = vector.broadcast %117 : vector<1x128xi1> to vector<32x128xi1>
    %119 = vector.broadcast %cst_63 : f32 to vector<32x128xf32>
    %120 = arith.select %118, %116, %119 : vector<32x128xi1>, vector<32x128xf32>
    %121 = vector.extract_strided_slice %120 {offsets = [0, 0], sizes = [8, 128], strides = [1, 1]} : vector<32x128xf32> to vector<8x128xf32>
    %c0_64 = arith.constant 0 : index
    %c0_65 = arith.constant 0 : index
    %122 = vector.load %arg10[%c0_64, %c0_65] : memref<8x128xf32, #tpu.memory_space<vmem>>, vector<8x128xf32>
    tpu.vector_store %arg10[%c0_64, %c0_65], %121 {strides = array<i32>} : memref<8x128xf32, #tpu.memory_space<vmem>>, vector<8x128xf32>,
    %cst_66 = arith.constant dense<0xFF800000> : vector<32xf32>
    %123 = vector.multi_reduction <maximumf>, %120, %cst_66 [1] : vector<32x128xf32> to vector<32xf32>
    %124 = vector.shape_cast %123 : vector<32xf32> to vector<32x1xf32>
    %125 = vector.broadcast %124 : vector<32x1xf32> to vector<32x128xf32>
    %126 = arith.subf %120, %125 : vector<32x128xf32>
    %127 = math.exp %126 : vector<32x128xf32>
    %cst_67 = arith.constant dense<0.000000e+00> : vector<32xf32>
    %128 = vector.multi_reduction <add>, %127, %cst_67 [1] : vector<32x128xf32> to vector<32xf32>
    %129 = vector.shape_cast %128 : vector<32xf32> to vector<32x1xf32>
    %130 = math.log %129 : vector<32x1xf32>
    %131 = vector.broadcast %130 : vector<32x1xf32> to vector<32x128xf32>
    %132 = arith.subf %126, %131 : vector<32x128xf32>
    %cst_68 = arith.constant 0.000000e+00 : f32
    %133 = vector.broadcast %cst_68 : f32 to vector<32x128xf32>
    %134 = arith.subf %133, %103 : vector<32x128xf32>
    %135 = arith.mulf %134, %132 : vector<32x128xf32>
    %136 = tpu.iota {dimensions = array<i32: 0>} : vector<32x128xi32>
    %c8_i32_69 = arith.constant 8 : i32
    %137 = vector.broadcast %c8_i32_69 : i32 to vector<32x128xi32>
    %138 = arith.cmpi slt, %136, %137 : vector<32x128xi32>
    %cst_70 = arith.constant 0.000000e+00 : f32
    %139 = vector.broadcast %cst_70 : f32 to vector<32x128xf32>
    %140 = arith.select %138, %135, %139 : vector<32x128xi1>, vector<32x128xf32>
    %cst_71 = arith.constant dense<0.000000e+00> : vector<128xf32>
    %141 = vector.multi_reduction <add>, %140, %cst_71 [0] : vector<32x128xf32> to vector<128xf32>
    %142 = vector.shape_cast %141 : vector<128xf32> to vector<1x128xf32>
    %c0_72 = arith.constant 0 : index
    %c0_73 = arith.constant 0 : index
    %143 = vector.load %arg13[%c0_72, %c0_73] : memref<1x128xf32, #tpu.memory_space<vmem>>, vector<1x128xf32>
    tpu.vector_store %arg13[%c0_72, %c0_73], %142 {strides = array<i32>} : memref<1x128xf32, #tpu.memory_space<vmem>>, vector<1x128xf32>,
    %cst_74 = arith.constant 0.000000e+00 : f32
    %144 = vector.broadcast %cst_74 : f32 to vector<32x128xf32>
    %145 = arith.select %138, %144, %135 : vector<32x128xi1>, vector<32x128xf32>
    %cst_75 = arith.constant dense<0.000000e+00> : vector<128xf32>
    %146 = vector.multi_reduction <add>, %145, %cst_75 [0] : vector<32x128xf32> to vector<128xf32>
    %147 = vector.shape_cast %146 : vector<128xf32> to vector<1x128xf32>
    %c0_76 = arith.constant 0 : index
    %c0_77 = arith.constant 0 : index
    %148 = vector.load %arg14[%c0_76, %c0_77] : memref<1x128xf32, #tpu.memory_space<vmem>>, vector<1x128xf32>
    tpu.vector_store %arg14[%c0_76, %c0_77], %147 {strides = array<i32>} : memref<1x128xf32, #tpu.memory_space<vmem>>, vector<1x128xf32>,
    return
  }
}

</mosaic_0001>

<bundles_post_ra>
// kernel: tpu_custom_call.1
= control target key start
LH: loop header
LB: loop body
LE: loop exit
PB: predicated region body
PF: predicated region fallthrough
CT: control target
= control target key end

     0   :  { %21 = vsyncpa [#allocation5], 0  ;;  %s2125_s0 = inlined_call_operand.<no memory space> [shape: f32[1,1], index: 0, kind: input, shape index: {}]   ;;  %s2126_s1 = inlined_call_operand.hbm [shape: bf16[32,256], index: 1, kind: input, shape index: {}]   ;;  %s2127_s2 = inlined_call_operand.hbm [shape: bf16[32,256], index: 2, kind: input, shape index: {}]   ;;  %s2128_s3 = inlined_call_operand.vmem [shape: f32[8,128], index: 3, kind: input, shape index: {}]   ;;  %s2129_s4 = inlined_call_operand.hbm [shape: f32[32,32], index: 4, kind: input, shape index: {}]   ;;  %s2130_s5 = inlined_call_operand.vmem [shape: f32[1,128], index: 5, kind: input, shape index: {}]   ;;  %s2131_s6 = inlined_call_operand.hbm [shape: bf16[256,128], index: 6, kind: input, shape index: {}]   ;;  %s2132_s7 = inlined_call_operand.vmem [shape: f32[1,128], index: 7, kind: input, shape index: {}]   ;;  %s2133_s8 = inlined_call_operand.hbm [shape: bf16[128,128], index: 8, kind: input, shape index: {}]   ;;  %s2134_s9 = inlined_call_operand.vmem [shape: f32[1,128], index: 9, kind: input, shape index: {}]   ;;  %s2135_s10 = inlined_call_operand.hbm [shape: f32[8,128], index: 10, kind: output, shape index: {0}]   ;;  %s2136_s11 = inlined_call_operand.hbm [shape: f32[1,128], index: 11, kind: output, shape index: {1}]   ;;  %s2137_s12 = inlined_call_operand.hbm [shape: f32[1,128], index: 12, kind: output, shape index: {2}]   ;;  %s2138_s13 = inlined_call_operand.hbm [shape: f32[1,128], index: 13, kind: output, shape index: {3}]   ;;  %s2139_s14 = inlined_call_operand.hbm [shape: f32[1,128], index: 14, kind: output, shape index: {4}]  }
   0x1   :  { %22 = vsyncpa [#allocation8], 0 }
   0x2   :  { %23 = vsyncpa [#allocation11], 0 }
   0x3   :  { %24 = vsyncpa [#allocation6], 0 }
   0x4   :  { %25 = vsyncpa [#allocation15], 0 }
   0x5   :  { %26 = vsyncpa [#allocation18], 0  ;;  %s1717_s29 = smov [#allocation7]   ;;  %s1718_s15 = smov [#allocation10]  }
   0x6   :  { %s46_s30 = sshll.u32 %s1717_s29, 4  ;;  %s74_s16 = sshll.u32 %s1718_s15, 4  ;;  %s47_s30 = int_to_ptr.vmem [resolvable:$true] %s46_s30  ;;  %s1806_s16 = int_to_ptr.vmem [resolvable:$true] %s74_s16 }
   0x7   :  { %s1485_s19 = scalar_lea.hbm %s2127_s2, 512 }
   0x8   :  { %p1486_p0 = scmp.ne.s32.totalorder %s2127_s2, %s1485_s19  ;;  %p1489_p1 = scmp.lt.u32.totalorder %s1485_s19, %s2127_s2 }
   0xa   :  { %p1491_p2 = pnand %p1489_p1, %p1486_p0 }
   0xc   :  { %1494 = shalt.err (!%p1491_p2)
}
   0xd   :  { %s1495_s24 = scalar_lea.vmem %s47_s30, 512  ;;  %p1500_p4 = scmp.lt.s32.totalorder %s47_s30, %s47_s30 }
   0xe   :  { %p1496_p3 = scmp.ne.s32.totalorder %s47_s30, %s1495_s24  ;;  %p1501_p5 = scmp.lt.s32.totalorder %s1495_s24, %s1495_s24 }
  0x10   :  { %p1502_p6 = por %p1501_p5, %p1500_p4 }
  0x12   :  { %p1503_p7 = pnand %p1502_p6, %p1496_p3 }
  0x14   :  { %1506 = shalt.err (!%p1503_p7)
}
  0x15   :  { %s2140_s25 = smov 128   ;;  %s1720_s26 = smov 8  }
  0x16   :  { %52 = dma.hbm_to_vmem [thread:$0]  %s2127_s2, 512, %s47_s30, [#allocation8], %s2140_s25, %s2140_s25, %s1720_s26  }
  0x17   :  { %s1507_s17 = scalar_lea.hbm %s2131_s6, 2048 }
  0x18   :  { %p1508_p8 = scmp.ne.s32.totalorder %s2131_s6, %s1507_s17  ;;  %p1511_p9 = scmp.lt.u32.totalorder %s1507_s17, %s2131_s6 }
  0x1a   :  { %p1513_p10 = pnand %p1511_p9, %p1508_p8 }
  0x1c   :  { %1516 = shalt.err (!%p1513_p10)
}
  0x1d   :  { %s1517_s22 = scalar_lea.vmem %s1806_s16, 2048  ;;  %p1522_p12 = scmp.lt.s32.totalorder %s1806_s16, %s1806_s16 }
  0x1e   :  { %p1518_p11 = scmp.ne.s32.totalorder %s1806_s16, %s1517_s22  ;;  %p1523_p13 = scmp.lt.s32.totalorder %s1517_s22, %s1517_s22 }
  0x20   :  { %p1524_p0 = por %p1523_p13, %p1522_p12 }
  0x22   :  { %p1525_p1 = pnand %p1524_p0, %p1518_p11 }
  0x24   :  { %1528 = shalt.err (!%p1525_p1)
}
  0x25   :  { %s1721_s2 = smov 64   ;;  %s1722_s30 = smov 4  }
  0x26   :  { %80 = dma.hbm_to_vmem [thread:$0]  %s2131_s6, 2048, %s1806_s16, [#allocation11], %s1721_s2, %s1721_s2, %s1722_s30  }
  0x27   :  { %s1723_s27 = smov [#allocation4]   ;;  %s1724_s29 = smov [#allocation9]  }
  0x28   :  { %s34_s28 = sshll.u32 %s1723_s27, 4  ;;  %s60_s15 = sshll.u32 %s1724_s29, 4  ;;  %s35_s28 = int_to_ptr.vmem [resolvable:$true] %s34_s28  ;;  %s1843_s15 = int_to_ptr.vmem [resolvable:$true] %s60_s15 }
  0x29   :  { %s1529_s19 = scalar_lea.hbm %s2126_s1, 512 }
  0x2a   :  { %p1530_p2 = scmp.ne.s32.totalorder %s2126_s1, %s1529_s19  ;;  %p1533_p3 = scmp.lt.u32.totalorder %s1529_s19, %s2126_s1 }
  0x2c   :  { %p1535_p4 = pnand %p1533_p3, %p1530_p2 }
  0x2e   :  { %1538 = shalt.err (!%p1535_p4)
}
  0x2f   :  { %s1539_s6 = scalar_lea.vmem %s35_s28, 512  ;;  %p1544_p6 = scmp.lt.s32.totalorder %s35_s28, %s35_s28 }
  0x30   :  { %p1540_p5 = scmp.ne.s32.totalorder %s35_s28, %s1539_s6  ;;  %p1545_p7 = scmp.lt.s32.totalorder %s1539_s6, %s1539_s6 }
  0x32   :  { %p1546_p8 = por %p1545_p7, %p1544_p6 }
  0x34   :  { %p1547_p9 = pnand %p1546_p8, %p1540_p5 }
  0x36   :  { %1550 = shalt.err (!%p1547_p9)
}
  0x37   :  { %s2142_s16 = smov 128   ;;  %s1551_s25 = scalar_lea.hbm %s2129_s4, 512 }
  0x38   :  { %40 = dma.hbm_to_vmem [thread:$0]  %s2126_s1, 512, %s35_s28, [#allocation5], %s2142_s16, %s2142_s16, %s1720_s26  }
  0x39   :  { %p1552_p10 = scmp.ne.s32.totalorder %s2129_s4, %s1551_s25  ;;  %p1555_p11 = scmp.lt.u32.totalorder %s1551_s25, %s2129_s4 }
  0x3b   :  { %p1557_p12 = pnand %p1555_p11, %p1552_p10 }
  0x3d   :  { %1560 = shalt.err (!%p1557_p12)
}
  0x3e   :  { %s1561_s21 = scalar_lea.vmem %s1843_s15, 512  ;;  %p1566_p0 = scmp.lt.s32.totalorder %s1843_s15, %s1843_s15 }
  0x3f   :  { %p1562_p13 = scmp.ne.s32.totalorder %s1843_s15, %s1561_s21  ;;  %p1567_p1 = scmp.lt.s32.totalorder %s1561_s21, %s1561_s21 }
  0x41   :  { %p1568_p2 = por %p1567_p1, %p1566_p0 }
  0x43   :  { %p1569_p3 = pnand %p1568_p2, %p1562_p13 }
  0x45   :  { %1572 = shalt.err (!%p1569_p3)
}
  0x46   :  { %66 = dma.hbm_to_vmem [thread:$0]  %s2129_s4, 512, %s1843_s15, [#allocation8], %s2142_s16, %s2142_s16, %s1720_s26  }
  0x47   :  { %s1725_s22 = smov [#allocation12]   ;;  %s1573_s27 = scalar_lea.hbm %s2133_s8, 1024 }
  0x48   :  { %s88_s6 = sshll.u32 %s1725_s22, 4  ;;  %p1574_p4 = scmp.ne.s32.totalorder %s2133_s8, %s1573_s27  ;;  %s89_s6 = int_to_ptr.vmem [resolvable:$true] %s88_s6 }
  0x49   :  { %p1577_p5 = scmp.lt.u32.totalorder %s1573_s27, %s2133_s8 }
  0x4b   :  { %p1579_p6 = pnand %p1577_p5, %p1574_p4 }
  0x4d   :  { %1582 = shalt.err (!%p1579_p6)
}
  0x4e   :  { %s1583_s19 = scalar_lea.vmem %s89_s6, 1024  ;;  %p1588_p8 = scmp.lt.s32.totalorder %s89_s6, %s89_s6 }
  0x4f   :  { %p1584_p7 = scmp.ne.s32.totalorder %s89_s6, %s1583_s19  ;;  %p1589_p9 = scmp.lt.s32.totalorder %s1583_s19, %s1583_s19 }
  0x51   :  { %p1590_p10 = por %p1589_p9, %p1588_p8 }
  0x53   :  { %p1591_p11 = pnand %p1590_p10, %p1584_p7 }
  0x55   :  { %1594 = shalt.err (!%p1591_p11)
}
  0x56   :  { %94 = dma.hbm_to_vmem [thread:$0]  %s2133_s8, 1024, %s89_s6, [#allocation11], %s1721_s2, %s1721_s2, %s1722_s30  }
  0x57   :  { %1705 = dma.done.wait [#allocation5], 512  }
  0x58   :  { %1706 = vsyncadd [#allocation5], 4294966784 }
  0x59   :  { %1707 = dma.done.wait [#allocation8], 1024  }
  0x5a   :  { %1708 = vsyncadd [#allocation8], 4294966272 }
  0x5b   :  { %1709 = dma.done.wait [#allocation11], 3072  }
  0x5c   :  { %1710 = vsyncadd [#allocation11], 4294964224  ;;  %v1403_v0 = vld [vmem:[#allocation10 + $0x40] sm:$0xff]   ;;  %v1405_v2 = vld [vmem:[#allocation10 + $0x48] sm:$0xff]   ;;  %v113_v55 = vlaneseq  ;;  %p625_p12 = scmp.ne.f32.partialorder %s2125_s0, %s2125_s0  ;;  %s626_s21 = sshrl.u32 %s2125_s0, 16  ;;  %vm525_vm1 = vcmask 261120  }
  0x5d   :  { %v1404_v1 = vld [vmem:[#allocation10] sm:$0xff]   ;;  %1243 = vmatprep.subr.bf16.mxu0 %v1403_v0  ;;  %v1406_v3 = vld [vmem:[#allocation10 + $0x8] sm:$0xff]   ;;  %v1407_v4 = vld [vmem:[#allocation10 + $0x50] sm:$0xff]   ;;  %s627_s1 = sand.u32 1, %s626_s21  ;;  %s1946_s6 = ssub.f32 1.0, %s2125_s0 }
  0x5e   :  { %1244 = vmatpush3.bf16.msra.mxu0 %v1404_v1  ;;  %v1408_v5 = vld [vmem:[#allocation10 + $0x10] sm:$0xff]   ;;  %v1409_v6 = vld [vmem:[#allocation10 + $0x58] sm:$0xff]   ;;  %v1411_v8 = vld [vmem:[#allocation10 + $0x60] sm:$0xff]   ;;  %v1920_v56 = vand.u32 127, %v113_v55  ;;  %s628_s23 = sadd.s32 32767, %s627_s1 }
  0x5f   :  { %1245 = vmatprep.subr.bf16.mxu0 %v1405_v2  ;;  %v1410_v7 = vld [vmem:[#allocation10 + $0x18] sm:$0xff]   ;;  %v1412_v9 = vld [vmem:[#allocation10 + $0x20] sm:$0xff]   ;;  %v1413_v10 = vld [vmem:[#allocation10 + $0x68] sm:$0xff]   ;;  %s629_s29 = sadd.s32 %s628_s23, %s2125_s0  ;;  %s637_s17 = sshrl.u32 %s1946_s6, 16 }
  0x60   :  { %v1895_v11 = vld [vmem:[#allocation4] sm:$0xff]  ;;  %v1897_v12 = vld [vmem:[#allocation4 + $0x8] sm:$0xff]  ;;  %v1415_v15 = vld [vmem:[#allocation10 + $0x70] sm:$0xff]   ;;  %vm115_vm0 = vcmp.lt.s32.totalorder %v1920_v56, 8  ;;  %s630_s25 = sand.u32 4294901760, %s629_s29  ;;  %p636_p13 = scmp.ne.f32.partialorder %s1946_s6, %s1946_s6 }
  0x61   :  { %v1414_v13 = vld [vmem:[#allocation10 + $0x28] sm:$0xff]   ;;  %v1180_v14 = vcombine.high %v1895_v11, %v1897_v12  ;;  %v1423_v16 = vld [vmem:[#allocation12] sm:$0xff]   ;;  %v1425_v18 = vld [vmem:[#allocation12 + $0x10] sm:$0xff]   ;;  %v1179_v24 = vcombine.low %v1895_v11, %v1897_v12  ;;  %s2144_s25 = smov (%p625_p12, %s630_s25), 2143289344  ;;  %s638_s18 = sand.u32 1, %s637_s17 }
  0x62   :  { %1246 = vmatpush3.bf16.msra.mxu0 %v1406_v3  ;;  %v1424_v17 = vld [vmem:[#allocation12 + $0x8] sm:$0xff]   ;;  %1327 = vmatprep.subr.bf16.mxu1 %v1423_v16  ;;  %v1416_v19 = vld [vmem:[#allocation10 + $0x30] sm:$0xff]   ;;  %v1417_v20 = vld [vmem:[#allocation10 + $0x78] sm:$0xff]   ;;  %s633_s19 = sshrl.u32 %s2144_s25, 16  ;;  %s639_s4 = sadd.s32 32767, %s638_s18 }
  0x63   :  { %1247 = vmatprep.subr.bf16.mxu0 %v1407_v4  ;;  %307 = vmatprep.mubr.bf16.mxu0 %v1180_v14  ;;  %v1418_v21 = vld [vmem:[#allocation10 + $0x38] sm:$0xff]   ;;  %v1901_v22 = vld [vmem:[#allocation4 + $0x10] sm:$0xff]  ;;  %v1427_v28 = vld [vmem:[#allocation12 + $0x20] sm:$0xff]   ;;  %s640_s26 = sadd.s32 %s639_s4, %s1946_s6  ;;  %s649_s8 = sshll.u32 %s633_s19, 16 }
  0x64   :  { %1328 = vmatpush3.bf16.msra.mxu1 %v1423_v16  ;;  %v1903_v23 = vld [vmem:[#allocation4 + $0x18] sm:$0xff]  ;;  %v1428_v29 = vld [vmem:[#allocation12 + $0x28] sm:$0xff]   ;;  %v1429_v30 = vld [vmem:[#allocation12 + $0x30] sm:$0xff]   ;;  %s641_s2 = sand.u32 4294901760, %s640_s26 }
  0x65   :  { %1329 = vmatprep.subr.bf16.mxu1 %v1424_v17  ;;  %v1182_v25 = vcombine.high %v1901_v22, %v1903_v23  ;;  %v1181_v26 = vcombine.low %v1901_v22, %v1903_v23  ;;  %v1426_v27 = vld [vmem:[#allocation12 + $0x18] sm:$0xff]   ;;  %v1914_v34 = vld [vmem:[%s2132_s7] ss:$0 sm:$0xff]  ;;  %s650_s7 = sor.u32 %s649_s8, %s633_s19  ;;  %s2146_s2 = smov (%p636_p13, %s641_s2), 2143289344 }
  0x66   :  { %1248 = vmatpush3.bf16.msra.mxu0 %v1408_v5  ;;  %v1430_v31 = vld [vmem:[#allocation12 + $0x38] sm:$0xff]   ;;  %v1925_v58 = vld [vmem:[%s2134_s9] ss:$0 sm:$0xff]  ;;  %v651_v14 = vstv %s650_s7  ;;  %s644_s30 = sshrl.u32 %s2146_s2, 16 }
  0x67   :  { %1249 = vmatprep.subr.bf16.mxu0 %v1409_v6  ;;  %v1431_v4 = vld [vmem:[#allocation10 + $0x40] sm:$0xff]   ;;  %v1433_v6 = vld [vmem:[#allocation10 + $0x48] sm:$0xff]   ;;  %s661_s9 = sshll.u32 %s644_s30, 16 }
  0x68   :  { %1330 = vmatpush3.bf16.msra.mxu1 %v1424_v17  ;;  %v1432_v5 = vld [vmem:[#allocation10] sm:$0xff]   ;;  %v658_v17 = vld [vmem:[#allocation7 + $0x8] sm:$0xff]  ;;  %s662_s15 = sor.u32 %s661_s9, %s644_s30 }
  0x69   :  { %1331 = vmatprep.subr.bf16.mxu1 %v1425_v18  ;;  %v657_v16 = vld [vmem:[#allocation7] sm:$0xff] }
  0x6a   :  { %1250 = vmatpush3.bf16.msra.mxu0 %v1410_v7  ;;  %v1434_v7 = vld [vmem:[#allocation10 + $0x8] sm:$0xff]   ;;  %v1208_v55 = vld [vmem:[%s2130_s5] ss:$0 sm:$0xff] }
  0x6b   :  { %1251 = vmatprep.subr.bf16.mxu0 %v1411_v8  ;;  %v1435_v8 = vld [vmem:[#allocation10 + $0x50] sm:$0xff]  }
  0x6c   :  { %1332 = vmatpush3.bf16.msra.mxu1 %v1425_v18  ;;  %v653_v18 = vmul.bf16 %v651_v14, %v1895_v11  ;;  %v1444_v11 = vld [vmem:[#allocation10 + $0x30] sm:$0xff]  }
  0x6d   :  { %1333 = vmatprep.subr.bf16.mxu1 %v1426_v27 }
  0x6e   :  { %1252 = vmatpush3.bf16.msra.mxu0 %v1412_v9  ;;  %v1436_v9 = vld [vmem:[#allocation10 + $0x10] sm:$0xff]  }
  0x6f   :  { %1253 = vmatprep.subr.bf16.mxu0 %v1413_v10  ;;  %v1437_v10 = vld [vmem:[#allocation10 + $0x58] sm:$0xff]  }
  0x70   :  { %1334 = vmatpush3.bf16.msra.mxu1 %v1426_v27 }
  0x71   :  { %1335 = vmatprep.subr.bf16.mxu1 %v1427_v28 }
  0x72   :  { %1254 = vmatpush3.bf16.msra.mxu0 %v1414_v13  ;;  %v1438_v13 = vld [vmem:[#allocation10 + $0x18] sm:$0xff]  }
  0x73   :  { %1255 = vmatprep.subr.bf16.mxu0 %v1415_v15  ;;  %v1439_v15 = vld [vmem:[#allocation10 + $0x60] sm:$0xff]  }
  0x74   :  { %1336 = vmatpush3.bf16.msra.mxu1 %v1427_v28 }
  0x75   :  { %1337 = vmatprep.subr.bf16.mxu1 %v1428_v29 }
  0x76   :  { %1256 = vmatpush3.bf16.msra.mxu0 %v1416_v19  ;;  %v654_v19 = vmul.bf16 %v651_v14, %v1897_v12  ;;  %v655_v12 = vmul.bf16 %v651_v14, %v1901_v22 }
  0x77   :  { %1257 = vmatprep.subr.bf16.mxu0 %v1417_v20  ;;  %v1440_v20 = vld [vmem:[#allocation10 + $0x20] sm:$0xff]  }
  0x78   :  { %1338 = vmatpush3.bf16.msra.mxu1 %v1428_v29  ;;  %v1442_v29 = vld [vmem:[#allocation10 + $0x28] sm:$0xff]  }
  0x79   :  { %1339 = vmatprep.subr.bf16.mxu1 %v1429_v30 }
  0x7a   :  { %1258 = vmatpush3.bf16.msra.mxu0 %v1418_v21  ;;  %v663_v21 = vstv %s662_s15 }
  0x7b   :  { %1289 = vmatprep.subr.bf16.mxu0 %v1431_v4  ;;  %v521_v4 = vld [vmem:[#allocation9] sm:$0xff] }
  0x7c   :  { %1340 = vmatpush3.bf16.msra.mxu1 %v1429_v30  ;;  %v1443_v30 = vld [vmem:[#allocation10 + $0x70] sm:$0xff]  }
  0x7d   :  { %308 = vmatmul.mubr.bf16.vlgmr.msra.gmra.mrb[0].mxu0 %v1179_v24  ;;  %1341 = vmatprep.subr.bf16.mxu1 %v1430_v31  ;;  %v1441_v24 = vld [vmem:[#allocation10 + $0x68] sm:$0xff]  }
  0x7e   :  { %315 = vmatprep.mubr.bf16.mxu0 %v1182_v25  ;;  %1290 = vmatpush3.bf16.msra.mxu0 %v1432_v5  ;;  %v665_v25 = vmul.bf16 %v663_v21, %v657_v16 }
  0x7f   :  { %1291 = vmatprep.subr.bf16.mxu0 %v1433_v6 }
  0x80   :  { %1342 = vmatpush3.bf16.msra.mxu1 %v1430_v31  ;;  %v669_v27 = vadd.bf16 %v665_v25, %v653_v18 }
  0x82   :  { %1292 = vmatpush3.bf16.msra.mxu0 %v1434_v7 }
  0x83   :  { %1293 = vmatprep.subr.bf16.mxu0 %v1435_v8 }
  0x85   :  { %316 = vmatmul.mubr.bf16.gmra.mrb[4].mxu0 %v1181_v26  ;;  %v666_v26 = vmul.bf16 %v663_v21, %v658_v17 }
  0x86   :  { %1294 = vmatpush3.bf16.msra.mxu0 %v1436_v9 }
  0x87   :  { %1295 = vmatprep.subr.bf16.mxu0 %v1437_v10  ;;  %v670_v28 = vadd.bf16 %v666_v26, %v654_v19 }
  0x89   :  { %v1215_v31 = vcombine.high %v669_v27, %v670_v28 }
  0x8a   :  { %1296 = vmatpush3.bf16.msra.mxu0 %v1438_v13 }
  0x8b   :  { %1297 = vmatprep.subr.bf16.mxu0 %v1439_v15  ;;  %874 = vmatprep.mubr.bf16.mxu0 %v1215_v31 }
  0x8e   :  { %1298 = vmatpush3.bf16.msra.mxu0 %v1440_v20 }
  0x8f   :  { %1299 = vmatprep.subr.bf16.mxu0 %v1441_v24 }
  0x92   :  { %1300 = vmatpush3.bf16.msra.mxu0 %v1442_v29 }
  0x93   :  { %1301 = vmatprep.subr.bf16.mxu0 %v1443_v30 }
  0x96   :  { %1302 = vmatpush3.bf16.msra.mxu0 %v1444_v11 }
 0x150   :  { %v1259_v32 = vpop.f32.mrb[0].mxu0 }
 0x151   :  { %v1260_v33 = vpop.f32.mrb[1].mxu0 }
 0x152   :  { %v1261_v35 = vadd.f32 %v1260_v33, %v1259_v32  ;;  %v1262_v36 = vpop.f32.mrb[2].mxu0  ;;  %v659_v32 = vld [vmem:[#allocation7 + $0x10] sm:$0xff]  ;;  %v660_v33 = vld [vmem:[#allocation7 + $0x18] sm:$0xff] }
 0x153   :  { %v1263_v37 = vpop.f32.mrb[3].mxu0 }
 0x154   :  { %v1264_v38 = vadd.f32 %v1263_v37, %v1262_v36  ;;  %v310_v39 = vadd.f32 %v1261_v35, %v1914_v34  ;;  %v656_v35 = vmul.bf16 %v651_v14, %v1903_v23  ;;  %v667_v36 = vmul.bf16 %v663_v21, %v659_v32 }
 0x155   :  { %v668_v37 = vmul.bf16 %v663_v21, %v660_v33  ;;  %v1977_v33 = vld [vmem:[%s2128_s3] sm:$0xff] }
 0x156   :  { %v313_v40 = vadd.f32 %v1264_v38, %v1914_v34  ;;  %v324_v42 = vmax.f32 %v310_v39, 0.0  ;;  %v1445_v38 = vld [vmem:[#allocation10 + $0x78] sm:$0xff]  }
 0x157   :  { %v1446_v39 = vld [vmem:[#allocation10 + $0x38] sm:$0xff]   ;;  %1303 = vmatprep.subr.bf16.mxu0 %v1445_v38  ;;  %v1448_v38 = vld [vmem:[#allocation12 + $0x8] sm:$0xff]  }
 0x158   :  { %v1265_v41 = vpop.f32.mrb[4].mxu0  ;;  %v325_v43 = vmax.f32 %v313_v40, 0.0  ;;  %v671_v40 = vadd.bf16 %v667_v36, %v655_v12  ;;  %1304 = vmatpush3.bf16.msra.mxu0 %v1446_v39  ;;  %v522_v36 = vld [vmem:[#allocation9 + $0x8] sm:$0xff]  ;;  %v524_v39 = vld [vmem:[#allocation9 + $0x18] sm:$0xff] }
 0x159   :  { %v1266_v44 = vpop.f32.mrb[5].mxu0 }
 0x15a   :  { %v1267_v45 = vadd.f32 %v1266_v44, %v1265_v41  ;;  %v1268_v46 = vpop.f32.mrb[6].mxu0  ;;  %v328_v47 = vpack.c.bf16 %v325_v43, %v324_v42  ;;  %v672_v41 = vadd.bf16 %v668_v37, %v656_v35  ;;  %v1214_v42 = vcombine.low %v669_v27, %v670_v28  ;;  %v523_v37 = vld [vmem:[#allocation9 + $0x10] sm:$0xff] }
 0x15b   :  { %v1269_v48 = vpop.f32.mrb[7].mxu0 }
 0x15c   :  { %v318_v49 = vadd.f32 %v1267_v45, %v1914_v34  ;;  %v1270_v50 = vadd.f32 %v1269_v48, %v1268_v46  ;;  %1343 = vmatprep.mubr.bf16.mxu1 %v328_v47  ;;  %v1217_v43 = vcombine.high %v671_v40, %v672_v41  ;;  %875 = vmatmul.mubr.bf16.vlgmr.msra.gmra.mrb[8].mxu0 %v1214_v42  ;;  %v1451_v42 = vld [vmem:[#allocation12 + $0x20] sm:$0xff]  }
 0x15d   :  { %v1216_v44 = vcombine.low %v671_v40, %v672_v41  ;;  %v1449_v40 = vld [vmem:[#allocation12 + $0x10] sm:$0xff]   ;;  %v1450_v41 = vld [vmem:[#allocation12 + $0x18] sm:$0xff]  }
 0x15e   :  { %v321_v51 = vadd.f32 %v1270_v50, %v1914_v34  ;;  %v326_v52 = vmax.f32 %v318_v49, 0.0  ;;  %882 = vmatprep.mubr.bf16.mxu0 %v1217_v43  ;;  %v1452_v43 = vld [vmem:[#allocation12 + $0x28] sm:$0xff]  }
 0x160   :  { %v327_v53 = vmax.f32 %v321_v51, 0.0 }
 0x162   :  { %v329_v54 = vpack.c.bf16 %v327_v53, %v326_v52 }
 0x164   :  { %1344 = vmatmul.mubr.bf16.vlgmr.msra.gmra.mrb[0].mxu1 %v329_v54  ;;  %883 = vmatmul.mubr.bf16.gmra.mrb[12].mxu0 %v1216_v44  ;;  %v1453_v44 = vld [vmem:[#allocation12 + $0x30] sm:$0xff]  }
 0x165   :  { %1355 = vmatprep.mubr.msk.f32.mxu1 %vm525_vm1, %v521_v4 }
 0x22f   :  { %v1305_v5 = vpop.f32.mrb[8].mxu0 }
 0x230   :  { %v1306_v6 = vpop.f32.mrb[9].mxu0 }
 0x231   :  { %v1307_v7 = vadd.f32 %v1306_v6, %v1305_v5  ;;  %v1308_v8 = vpop.f32.mrb[10].mxu0 }
 0x232   :  { %v1309_v9 = vpop.f32.mrb[11].mxu0 }
 0x233   :  { %v877_v10 = vadd.f32 %v1307_v7, %v1914_v34  ;;  %v1310_v13 = vadd.f32 %v1309_v9, %v1308_v8 }
 0x235   :  { %v880_v14 = vadd.f32 %v1310_v13, %v1914_v34  ;;  %v891_v16 = vmax.f32 %v877_v10, 0.0 }
 0x237   :  { %v1345_v57 = vpop.f32.mrb[0].mxu1  ;;  %v1311_v15 = vpop.f32.mrb[12].mxu0  ;;  %v892_v17 = vmax.f32 %v880_v14, 0.0 }
 0x238   :  { %v435_v59 = vpop.f32.mrb[1].mxu1  ;;  %v1312_v18 = vpop.f32.mrb[13].mxu0 }
 0x239   :  { %v1346_v60 = vpop.f32.mrb[2].mxu1  ;;  %v1313_v19 = vadd.f32 %v1312_v18, %v1311_v15  ;;  %v1314_v20 = vpop.f32.mrb[14].mxu0  ;;  %v895_v24 = vpack.c.bf16 %v892_v17, %v891_v16 }
 0x23a   :  { %v445_v61 = vadd.f32 %v1346_v60, %v1925_v58  ;;  %v1929_v62 = vpop.f32.mrb[3].mxu1  ;;  %v1315_v21 = vpop.f32.mrb[15].mxu0 }
 0x23b   :  { %v885_v25 = vadd.f32 %v1313_v19, %v1914_v34  ;;  %v1316_v26 = vadd.f32 %v1315_v21, %v1314_v20  ;;  %v438_v7 = vadd.f32 %v1925_v58, %v1929_v62 }
 0x23c   :  { %v451_v63 = vsel %vm115_vm0, %v445_v61, -1e+30 }
 0x23d   :  { %452 = vmax.xlane.f32.xlu0 %v451_v63  ;;  %v893_v27 = vmax.f32 %v885_v25, 0.0  ;;  %v888_v28 = vadd.f32 %v1316_v26, %v1914_v34  ;;  %v1447_v34 = vld [vmem:[#allocation12] sm:$0xff]   ;;  %v450_v9 = vsel %vm115_vm0, %v438_v7, -1e+30 }
 0x23f   :  { %v894_v29 = vmax.f32 %v888_v28, 0.0 }
 0x241   :  { %v896_v30 = vpack.c.bf16 %v894_v29, %v893_v27 }
 0x2ca   :  { %v453_v0 = vpop.xlane.xlu0 %452 }
 0x2cb   :  { %v454_v1 = vsub.f32 %v451_v63, %v453_v0 }
 0x2cd   :  { %v455_v2 = vmul.f32 1.442695, %v454_v1 }
 0x2cf   :  { %1455 = vpow2.f32 %v455_v2 }
 0x2d9   :  { %v1933_v3 = vpop.eup %1455 }
 0x2da   :  { %457 = vadd.xlane.f32.xlu0 %v1933_v3 }
 0x367   :  { %v458_v45 = vpop.xlane.xlu0 %457 }
 0x368   :  { %1457 = vrcp.f32 %v458_v45  ;;  %v1454_v45 = vld [vmem:[#allocation12 + $0x38] sm:$0xff]  }
 0x372   :  { %v1458_v22 = vpop.eup %1457 }
 0x373   :  { %v460_v23 = vmul.f32 %v1458_v22, %v1933_v3  ;;  %v673_v22 = vstv %s2125_s0 }
 0x375   :  { %v461_v46 = vrot.slane %v460_v23, 4  ;;  %v479_v57 = vmul.f32 %v1208_v55, %v460_v23 }
 0x377   :  { %v462_v47 = vadd.f32 %v461_v46, %v460_v23  ;;  %v1992_v23 = vstv %s1946_s6  ;;  %s1726_s6 = smov [#allocation14]  }
 0x378   :  { %s1123_s23 = sshll.u32 %s1726_s6, 4  ;;  %s1124_s23 = int_to_ptr.vmem [resolvable:$true] %s1123_s23 }
 0x379   :  { %v463_v48 = vrot.slane %v462_v47, 2  ;;  %s1595_s24 = scalar_lea.vmem %s1124_s23, 16  ;;  %s1599_s27 = scalar_lea.vmem %s1124_s23, 32 }
 0x37a   :  { %p1596_p0 = scmp.ne.s32.totalorder %s1124_s23, %s1595_s24  ;;  %p1600_p1 = scmp.lt.s32.totalorder %s1124_s23, %s1124_s23 }
 0x37b   :  { %v464_v49 = vadd.f32 %v463_v48, %v462_v47  ;;  %p1601_p2 = scmp.lt.s32.totalorder %s1599_s27, %s1595_s24 }
 0x37d   :  { %v465_v50 = vrot.slane %v464_v49, 1  ;;  %p1602_p3 = por %p1601_p2, %p1600_p1 }
 0x37f   :  { %v466_v51 = vadd.f32 %v465_v50, %v464_v49  ;;  %p1603_p4 = pnand %p1602_p3, %p1596_p0 }
 0x381   :  { %v468_v52 = vmul.f32 0.125, %v466_v51 }
 0x383   :  { %v470_v53 = vmax.f32 %v468_v52, 1e-12  ;;  %469 = vst [vmem:[#allocation14] sm:$0x1] %v468_v52 }
 0x385   :  { %v471_v54 = vsel %vm115_vm0, %v470_v53, 1.0 }
 0x386   :  { %1459 = vrcp.f32 %v471_v54 }
 0x390   :  { %v1460_v59 = vpop.eup %1459 }
 0x391   :  { %v481_v60 = vmul.f32 %v1460_v59, %v479_v57 }
 0x393   :  { %482 = vadd.xlane.f32.xlu1 %v481_v60 }
 0x420   :  { %v483_v61 = vpop.xlane.xlu1 %482 }
 0x421   :  { %1461 = vrcp.f32 %v483_v61 }
 0x42b   :  { %v1462_v63 = vpop.eup %1461 }
 0x42c   :  { %v485_v0 = vmul.f32 %v1462_v63, %v481_v60 }
 0x42e   :  { %v486_v1 = vsel %vm115_vm0, %v485_v0, 1.0 }
 0x42f   :  { %v487_v2 = vmul.f32 %v486_v1, %v486_v1 }
 0x431   :  { %v488_v3 = vsel %vm115_vm0, %v487_v2, 0.0 }
 0x432   :  { %489 = vadd.xlane.f32.xlu1 %v488_v3 }
 0x4bf   :  { %v490_v31 = vpop.xlane.xlu1 %489 }
 0x4c0   :  { %1463 = vrcp.f32 %v490_v31 }
 0x4ca   :  { %v1464_v32 = vpop.eup %1463 }
 0x4cb   :  { %v1979_v11 = vmul.f32 %v1464_v32, %v488_v3 }
 0x4cd   :  { %v1381_v12 = vpack.c.bf16 %v1979_v11, %v1977_v33  ;;  %v1385_v35 = vpack.c.bf16 %v1979_v11, %v1979_v11  ;;  %v675_v47 = vmul.f32 %v673_v22, %v1979_v11 }
 0x4cf   :  { %1382 = vmatprep.subr.bf16.mxu1 %v1381_v12 }
 0x4d0   :  { %1384 = vmatpush3.bf16.msra.mxu1 %v1381_v12 }
 0x4d1   :  { %1386 = vmatprep.subr.bf16.mxu1 %v1385_v35 }
 0x4d4   :  { %1388 = vmatpush3.bf16.msra.mxu1 %v1385_v35 }
 0x4d5   :  { %1361 = vmatprep.subr.bf16.mxu1 %v1447_v34 }
 0x4d7   :  { %1356 = vmatmul.mubr.msk.f32.vlgmr.msra.gmra.mrb[4].mxu1 %vm525_vm1, %v522_v36 }
 0x4d8   :  { %1362 = vmatpush3.bf16.msra.mxu1 %v1447_v34  ;;  %1358 = vmatprep.mubr.msk.f32.mxu1 %vm525_vm1, %v523_v37 }
 0x4d9   :  { %1363 = vmatprep.subr.bf16.mxu1 %v1448_v38 }
 0x4db   :  { %1359 = vmatmul.mubr.msk.f32.gmra.mrb[6].mxu1 %vm525_vm1, %v524_v39 }
 0x4dc   :  { %1364 = vmatpush3.bf16.msra.mxu1 %v1448_v38  ;;  %1377 = vmatprep.mubr.bf16.mxu1 %v895_v24 }
 0x4dd   :  { %1365 = vmatprep.subr.bf16.mxu1 %v1449_v40 }
 0x4e0   :  { %1366 = vmatpush3.bf16.msra.mxu1 %v1449_v40 }
 0x4e1   :  { %1367 = vmatprep.subr.bf16.mxu1 %v1450_v41 }
 0x4e4   :  { %1368 = vmatpush3.bf16.msra.mxu1 %v1450_v41 }
 0x4e5   :  { %1369 = vmatprep.subr.bf16.mxu1 %v1451_v42 }
 0x4e8   :  { %1370 = vmatpush3.bf16.msra.mxu1 %v1451_v42 }
 0x4e9   :  { %1371 = vmatprep.subr.bf16.mxu1 %v1452_v43 }
 0x4ec   :  { %1372 = vmatpush3.bf16.msra.mxu1 %v1452_v43 }
 0x4ed   :  { %1373 = vmatprep.subr.bf16.mxu1 %v1453_v44 }
 0x4f0   :  { %1374 = vmatpush3.bf16.msra.mxu1 %v1453_v44 }
 0x4f1   :  { %1375 = vmatprep.subr.bf16.mxu1 %v1454_v45 }
 0x4f4   :  { %1376 = vmatpush3.bf16.msra.mxu1 %v1454_v45 }
 0x4f7   :  { %1378 = vmatmul.mubr.bf16.vlgmr.msra.gmra.mrb[8].mxu1 %v896_v30 }
 0x5aa   :  { %v1357_v46 = vpop.f32.mrb[4].mxu1 }
 0x5ab   :  { %v680_v48 = vmul.f32 %v1357_v46, %v1992_v23  ;;  %v2000_v49 = vpop.f32.mrb[5].mxu1 }
 0x5ad   :  { %v2002_v50 = vadd.f32 %v680_v48, %v675_v47 }
 0x5ae   :  { %v1360_v51 = vpop.f32.mrb[6].mxu1 }
 0x5af   :  { %v682_v52 = vmul.f32 %v1360_v51, %v1992_v23  ;;  %v614_v53 = vpop.f32.mrb[7].mxu1 }
 0x5b0   :  { %v681_v54 = vmul.f32 %v1992_v23, %v614_v53 }
 0x5b1   :  { %v2006_v55 = vadd.f32 %v682_v52, %v675_v47 }
 0x5b2   :  { %v2008_v57 = vadd.f32 %v681_v54, %v675_v47 }
 0x5ca   :  { %v1379_v59 = vpop.f32.mrb[8].mxu1 }
 0x5cb   :  { %v1011_v60 = vadd.f32 %v1379_v59, %v1925_v58  ;;  %v1002_v61 = vpop.f32.mrb[9].mxu1 }
 0x5cc   :  { %v1003_v63 = vadd.f32 %v1925_v58, %v1002_v61  ;;  %v1380_v0 = vpop.f32.mrb[10].mxu1 }
 0x5cd   :  { %v1014_v1 = vadd.f32 %v1380_v0, %v1925_v58  ;;  %v1005_v2 = vpop.f32.mrb[11].mxu1  ;;  %v1019_v3 = vsel %vm115_vm0, %v1011_v60, -1e+30 }
 0x5ce   :  { %1026 = vmax.xlane.f32.xlu1 %v1019_v3  ;;  %v1017_v4 = vsel %vm115_vm0, %v1003_v63, -1e+30  ;;  %v1006_v5 = vadd.f32 %v1925_v58, %v1005_v2 }
 0x5cf   :  { %v1020_v6 = vsel %vm115_vm0, %v1014_v1, -1e+30  ;;  %1021 = vst [vmem:[#allocation13] sm:$0xff] %v1017_v4 }
 0x5d0   :  { %1028 = vmax.xlane.f32.xlu0 %v1020_v6  ;;  %v1018_v8 = vsel %vm115_vm0, %v1006_v5, -1e+30 }
 0x5d2   :  { %1022 = vmax.xlane.f32.xlu1 %v1017_v4 }
 0x5d4   :  { %1024 = vmax.xlane.f32.xlu0 %v1018_v8 }
 0x5d8   :  { %493 = vmax.xlane.f32.xlu0 %v450_v9 }
 0x65b   :  { %v1027_v10 = vpop.xlane.xlu1 %1026 }
 0x65c   :  { %v2026_v13 = vsub.f32 %v1019_v3, %v1027_v10 }
 0x65d   :  { %v1029_v14 = vpop.xlane.xlu0 %1028 }
 0x65e   :  { %v1038_v15 = vmul.f32 1.442695, %v2026_v13  ;;  %v2029_v16 = vsub.f32 %v1020_v6, %v1029_v14 }
 0x65f   :  { %v1023_v17 = vpop.xlane.xlu1 %1022 }
 0x660   :  { %1465 = vpow2.f32 %v1038_v15  ;;  %v1040_v58 = vmul.f32 1.442695, %v2029_v16  ;;  %v2032_v62 = vsub.f32 %v1017_v4, %v1023_v17 }
 0x661   :  { %v1025_v18 = vpop.xlane.xlu0 %1024 }
 0x662   :  { %1467 = vpow2.f32 %v1040_v58  ;;  %v1034_v56 = vmul.f32 1.442695, %v2032_v62  ;;  %v2035_v19 = vsub.f32 %v1018_v8, %v1025_v18 }
 0x664   :  { %1469 = vpow2.f32 %v1034_v56  ;;  %v1036_v20 = vmul.f32 1.442695, %v2035_v19 }
 0x665   :  { %v494_v21 = vpop.xlane.xlu0 %493 }
 0x666   :  { %1471 = vpow2.f32 %v1036_v20  ;;  %v2038_v24 = vsub.f32 %v450_v9, %v494_v21 }
 0x668   :  { %v496_v25 = vmul.f32 1.442695, %v2038_v24 }
 0x66a   :  { %v1466_v26 = vpop.eup %1465  ;;  %1473 = vpow2.f32 %v496_v25 }
 0x66b   :  { %1046 = vadd.xlane.f32.xlu0 %v1466_v26 }
 0x66c   :  { %v1468_v27 = vpop.eup %1467 }
 0x66d   :  { %1048 = vadd.xlane.f32.xlu1 %v1468_v27 }
 0x66e   :  { %v1470_v28 = vpop.eup %1469 }
 0x66f   :  { %1042 = vadd.xlane.f32.xlu0 %v1470_v28 }
 0x670   :  { %v1472_v29 = vpop.eup %1471 }
 0x671   :  { %1044 = vadd.xlane.f32.xlu1 %v1472_v29 }
 0x674   :  { %v1474_v30 = vpop.eup %1473 }
 0x675   :  { %498 = vadd.xlane.f32.xlu1 %v1474_v30 }
 0x676   :  { %1606 = shalt.err (!%p1603_p4)
}
 0x677   :  { %s1607_s17 = scalar_lea.hbm %s2136_s11, 16 }
 0x678   :  { %p1608_p5 = scmp.ne.s32.totalorder %s2136_s11, %s1607_s17  ;;  %p1611_p6 = scmp.lt.u32.totalorder %s1607_s17, %s2136_s11 }
 0x67a   :  { %p1613_p7 = pnand %p1611_p6, %p1608_p5 }
 0x67c   :  { %1616 = shalt.err (!%p1613_p7)
}
 0x67d   :  { %1126 = dma.vmem_to_hbm [thread:$0]  %s1124_s23, 16, %s2136_s11, [#allocation15]  }
 0x67e   :  { %s1727_s7 = smov [#allocation13]  }
 0x67f   :  { %s1113_s30 = sshll.u32 %s1727_s7, 4  ;;  %s1114_s30 = int_to_ptr.vmem [resolvable:$true] %s1113_s30 }
 0x680   :  { %s1617_s9 = scalar_lea.vmem %s1114_s30, 128  ;;  %p1622_p9 = scmp.lt.s32.totalorder %s1114_s30, %s1114_s30 }
 0x681   :  { %p1618_p8 = scmp.ne.s32.totalorder %s1114_s30, %s1617_s9  ;;  %p1623_p10 = scmp.lt.s32.totalorder %s1617_s9, %s1617_s9 }
 0x683   :  { %p1624_p11 = por %p1623_p10, %p1622_p9 }
 0x685   :  { %p1625_p12 = pnand %p1624_p11, %p1618_p8 }
 0x687   :  { %1628 = shalt.err (!%p1625_p12)
}
 0x688   :  { %s1629_s20 = scalar_lea.hbm %s2135_s10, 128 }
 0x689   :  { %p1630_p13 = scmp.ne.s32.totalorder %s2135_s10, %s1629_s20  ;;  %p1633_p0 = scmp.lt.u32.totalorder %s1629_s20, %s2135_s10 }
 0x68b   :  { %p1635_p1 = pnand %p1633_p0, %p1630_p13 }
 0x68d   :  { %1638 = shalt.err (!%p1635_p1)
}
 0x68e   :  { %1116 = dma.vmem_to_hbm [thread:$0]  %s1114_s30, 128, %s2135_s10, [#allocation6]   ;;  %v674_v34 = vmul.f32 %v673_v22, %v1977_v33  ;;  %v679_v36 = vmul.f32 %v1992_v23, %v2000_v49  ;;  %v1063_v33 = vsub.f32 0.0, %v2002_v50  ;;  %v1064_v22 = vsub.f32 0.0, %v2008_v57 }
 0x68f   :  { %v1065_v54 = vsub.f32 0.0, %v2006_v55  ;;  %v503_v0 = vsub.f32 0.0, %v1979_v11  ;;  %s1728_s0 = smov [#allocation17]   ;;  %s1729_s23 = smov [#allocation16]  }
 0x690   :  { %v683_v40 = vadd.f32 %v679_v36, %v674_v34  ;;  %s1143_s10 = sshll.u32 %s1728_s0, 4  ;;  %s1133_s24 = sshll.u32 %s1729_s23, 4  ;;  %s1144_s10 = int_to_ptr.vmem [resolvable:$true] %s1143_s10  ;;  %s1134_s24 = int_to_ptr.vmem [resolvable:$true] %s1133_s24 }
 0x691   :  { %s1639_s27 = scalar_lea.vmem %s1144_s10, 16  ;;  %s1643_s29 = scalar_lea.vmem %s1144_s10, 32 }
 0x692   :  { %v1062_v46 = vsub.f32 0.0, %v683_v40  ;;  %p1640_p2 = scmp.ne.s32.totalorder %s1144_s10, %s1639_s27  ;;  %p1644_p3 = scmp.lt.s32.totalorder %s1144_s10, %s1144_s10 }
 0x693   :  { %p1645_p4 = scmp.lt.s32.totalorder %s1643_s29, %s1639_s27 }
 0x695   :  { %p1646_p5 = por %p1645_p4, %p1644_p3 }
 0x697   :  { %p1647_p6 = pnand %p1646_p5, %p1640_p2 }
 0x6f8   :  { %v1047_v31 = vpop.xlane.xlu0 %1046 }
 0x6f9   :  { %1475 = vlog2.f32 %v1047_v31 }
 0x6fa   :  { %v1049_v32 = vpop.xlane.xlu1 %1048 }
 0x6fb   :  { %1477 = vlog2.f32 %v1049_v32 }
 0x6fc   :  { %v1043_v12 = vpop.xlane.xlu0 %1042 }
 0x6fd   :  { %1479 = vlog2.f32 %v1043_v12 }
 0x6fe   :  { %v1045_v35 = vpop.xlane.xlu1 %1044 }
 0x6ff   :  { %1481 = vlog2.f32 %v1045_v35 }
 0x702   :  { %v499_v37 = vpop.xlane.xlu1 %498 }
 0x703   :  { %v1476_v38 = vpop.eup %1475  ;;  %1483 = vlog2.f32 %v499_v37 }
 0x704   :  { %v1055_v41 = vmul.f32 0.6931472, %v1476_v38 }
 0x705   :  { %v1478_v39 = vpop.eup %1477 }
 0x706   :  { %v1057_v43 = vmul.f32 0.6931472, %v1478_v39  ;;  %v1060_v47 = vsub.f32 %v2026_v13, %v1055_v41 }
 0x707   :  { %v1480_v42 = vpop.eup %1479 }
 0x708   :  { %v1051_v44 = vmul.f32 0.6931472, %v1480_v42  ;;  %v1061_v23 = vsub.f32 %v2029_v16, %v1057_v43  ;;  %v1068_v59 = vmul.f32 %v1064_v22, %v1060_v47 }
 0x709   :  { %v1482_v45 = vpop.eup %1481 }
 0x70a   :  { %v1058_v48 = vsub.f32 %v2032_v62, %v1051_v44  ;;  %v1053_v51 = vmul.f32 0.6931472, %v1482_v45  ;;  %v1069_v1 = vmul.f32 %v1065_v54, %v1061_v23 }
 0x70c   :  { %v1066_v49 = vmul.f32 %v1062_v46, %v1058_v48  ;;  %v1059_v52 = vsub.f32 %v2035_v19, %v1053_v51 }
 0x70d   :  { %v1484_v53 = vpop.eup %1483 }
 0x70e   :  { %v1086_v60 = vrot.slane %v1066_v49, 4  ;;  %v1067_v61 = vmul.f32 %v1063_v33, %v1059_v52  ;;  %v501_v63 = vmul.f32 0.6931472, %v1484_v53 }
 0x710   :  { %v1098_v2 = vadd.f32 %v1068_v59, %v1067_v61  ;;  %v502_v50 = vsub.f32 %v2038_v24, %v501_v63  ;;  %v1087_v3 = vadd.f32 %v1086_v60, %v1066_v49 }
 0x712   :  { %v1099_v57 = vadd.f32 %v1098_v2, %v1069_v1  ;;  %v504_v4 = vmul.f32 %v503_v0, %v502_v50  ;;  %v1088_v5 = vrot.slane %v1087_v3, 2 }
 0x714   :  { %v505_v6 = vrot.slane %v504_v4, 4  ;;  %v1089_v7 = vadd.f32 %v1088_v5, %v1087_v3  ;;  %v1100_v8 = vrot.slane %v1099_v57, 4 }
 0x716   :  { %v506_v55 = vadd.f32 %v505_v6, %v504_v4  ;;  %v1090_v9 = vrot.slane %v1089_v7, 1  ;;  %v1101_v10 = vadd.f32 %v1100_v8, %v1099_v57 }
 0x718   :  { %v1091_v13 = vadd.f32 %v1090_v9, %v1089_v7  ;;  %v507_v14 = vrot.slane %v506_v55, 2  ;;  %v1102_v11 = vrot.slane %v1101_v10, 2 }
 0x71a   :  { %1092 = vst [vmem:[#allocation17] sm:$0x1] %v1091_v13  ;;  %v508_v15 = vadd.f32 %v507_v14, %v506_v55  ;;  %v1103_v16 = vadd.f32 %v1102_v11, %v1101_v10 }
 0x71b   :  { %1650 = shalt.err (!%p1647_p6)
}
 0x71c   :  { %s1651_s18 = scalar_lea.hbm %s2138_s13, 16 }
 0x71d   :  { %p1652_p7 = scmp.ne.s32.totalorder %s2138_s13, %s1651_s18  ;;  %p1655_p8 = scmp.lt.u32.totalorder %s1651_s18, %s2138_s13 }
 0x71f   :  { %p1657_p9 = pnand %p1655_p8, %p1652_p7 }
 0x721   :  { %1660 = shalt.err (!%p1657_p9)
}
 0x722   :  { %1146 = dma.vmem_to_hbm [thread:$0]  %s1144_s10, 16, %s2138_s13, [#allocation18]   ;;  %v509_v17 = vrot.slane %v508_v15, 1  ;;  %v1104_v58 = vrot.slane %v1103_v16, 1 }
 0x723   :  { %s1730_s30 = smov [#allocation19]   ;;  %s1661_s15 = scalar_lea.vmem %s1134_s24, 16 }
 0x724   :  { %s1153_s9 = sshll.u32 %s1730_s30, 4  ;;  %v510_v62 = vadd.f32 %v509_v17, %v508_v15  ;;  %v1105_v18 = vadd.f32 %v1104_v58, %v1103_v16  ;;  %p1662_p10 = scmp.ne.s32.totalorder %s1134_s24, %s1661_s15  ;;  %s2093_s9 = int_to_ptr.vmem [resolvable:$true] %s1153_s9 }
 0x725   :  { %s1665_s16 = scalar_lea.vmem %s1134_s24, 32  ;;  %p1666_p11 = scmp.lt.s32.totalorder %s1134_s24, %s1134_s24 }
 0x726   :  { %511 = vst [vmem:[#allocation16] sm:$0x1] %v510_v62  ;;  %1106 = vst [vmem:[#allocation19] sm:$0x1] %v1105_v18  ;;  %p1667_p12 = scmp.lt.s32.totalorder %s1665_s16, %s1661_s15 }
 0x728   :  { %p1668_p13 = por %p1667_p12, %p1666_p11 }
 0x72a   :  { %p1669_p0 = pnand %p1668_p13, %p1662_p10 }
 0x72c   :  { %1672 = shalt.err (!%p1669_p0)
}
 0x72d   :  { %s1673_s5 = scalar_lea.hbm %s2137_s12, 16 }
 0x72e   :  { %p1674_p1 = scmp.ne.s32.totalorder %s2137_s12, %s1673_s5  ;;  %p1677_p2 = scmp.lt.u32.totalorder %s1673_s5, %s2137_s12 }
 0x730   :  { %p1679_p3 = pnand %p1677_p2, %p1674_p1 }
 0x732   :  { %1682 = shalt.err (!%p1679_p3)
}
 0x733   :  { %1136 = dma.vmem_to_hbm [thread:$0]  %s1134_s24, 16, %s2137_s12, [#allocation15]  }
 0x734   :  { %s1683_s6 = scalar_lea.vmem %s2093_s9, 16  ;;  %s1687_s0 = scalar_lea.vmem %s2093_s9, 32 }
 0x735   :  { %p1684_p4 = scmp.ne.s32.totalorder %s2093_s9, %s1683_s6  ;;  %p1688_p5 = scmp.lt.s32.totalorder %s2093_s9, %s2093_s9 }
 0x736   :  { %p1689_p6 = scmp.lt.s32.totalorder %s1687_s0, %s1683_s6 }
 0x738   :  { %p1690_p7 = por %p1689_p6, %p1688_p5 }
 0x73a   :  { %p1691_p8 = pnand %p1690_p7, %p1684_p4 }
 0x73c   :  { %1694 = shalt.err (!%p1691_p8)
}
 0x73d   :  { %s1695_s27 = scalar_lea.hbm %s2139_s14, 16 }
 0x73e   :  { %p1696_p9 = scmp.ne.s32.totalorder %s2139_s14, %s1695_s27  ;;  %p1699_p10 = scmp.lt.u32.totalorder %s1695_s27, %s2139_s14 }
 0x740   :  { %p1701_p11 = pnand %p1699_p10, %p1696_p9 }
 0x742   :  { %1704 = shalt.err (!%p1701_p11)
}
 0x743   :  { %1156 = dma.vmem_to_hbm [thread:$0]  %s2093_s9, 16, %s2139_s14, [#allocation18]  }
 0x744   :  { %1711 = dma.done.wait [#allocation6], 128  }
 0x745   :  { %1712 = vsyncadd [#allocation6], 4294967168 }
 0x746   :  { %1713 = dma.done.wait [#allocation15], 32  }
 0x747   :  { %1714 = vsyncadd [#allocation15], 4294967264 }
 0x748   :  { %1715 = dma.done.wait [#allocation18], 32  }
 0x749   :  { %1716 = vsyncadd [#allocation18], 4294967264 }
 0x74a   :  { %1172 = vsyncpa [#allocation5], 1 }
 0x74b   :  { %1173 = vsyncpa [#allocation8], 1 }
 0x74c   :  { %1174 = vsyncpa [#allocation11], 1 }
 0x74d   :  { %1175 = vsyncpa [#allocation6], 1 }
 0x74e   :  { %1176 = vsyncpa [#allocation15], 1 }
 0x74f   :  { %1177 = vsyncpa [#allocation18], 1 }

</bundles_post_ra>
